<compile_context>
chip_gen: v7x
topology: tpu7x:2x2x1
jax: 0.10.0
libtpu: 0.0.40
codegen_flags: <defaults>
</compile_context>

<pallas_src>
import functools

import jax
import jax.numpy as jnp
from jax import lax
from jax.experimental import pallas as pl
from jax.experimental.pallas import tpu as pltpu

LANE = 128      # lane width (last dim of every tile)
MAX_TR = 512    # rows per tile: 512*128*4B = 256 KiB per input block


def _traj_loss_kernel(np_ref, fp_ref, nt_ref, ft_ref, out_ref, acc_ref,
                      *, valid_rows, tile_rows, mask_last):
    """Fused weighted-squared-difference accumulation over row tiles."""
    t = pl.program_id(0)

    @pl.when(t == 0)
    def _init():
        acc_ref[...] = jnp.zeros_like(acc_ref)

    nt = nt_ref[...]
    ft = ft_ref[...]
    dn = nt - np_ref[...]
    df = ft - fp_ref[...]
    # Single fused elementwise contribution (pure VPU, hidden under DMA).
    contrib = nt * dn * dn + ft * df * df

    if mask_last:
        # The final partial tile extends past the array; rows >= valid_rows
        # hold undefined VMEM contents, so mask them out.
        row = t * tile_rows + lax.broadcasted_iota(jnp.int32, contrib.shape, 0)
        contrib = jnp.where(row < valid_rows, contrib, 0.0)

    acc_ref[...] += contrib

    @pl.when(t == pl.num_programs(0) - 1)
    def _finalize():
        out_ref[0, 0] = jnp.sum(acc_ref[...])


def _to_rows(x):
    """Flatten to 1-D f32; pad (zeros) only if N is not a multiple of 128."""
    x = jnp.asarray(x, jnp.float32).reshape(-1)
    n = x.shape[0]
    pad = (-n) % LANE
    if pad:
        x = jnp.pad(x, (0, pad))  # zero pad contributes 0*(0-0)^2 = 0 exactly
    return x.reshape(-1, LANE)


def trajectory_distance_loss(nearest_distance_predict,
                             farest_distance_predict,
                             nearest_distance_target,
                             farest_distance_target,
                             sub=False,
                             r=10.0):
    np2d = _to_rows(nearest_distance_predict)
    fp2d = _to_rows(farest_distance_predict)
    nt2d = _to_rows(nearest_distance_target)
    ft2d = _to_rows(farest_distance_target)

    R = np2d.shape[0]  # static number of 128-wide rows

    if R <= MAX_TR:
        # Single block equal to the full array dims -> always in-bounds.
        tr = R
        grid = (1,)
        mask_last = False
    else:
        tr = MAX_TR
        grid = (pl.cdiv(R, tr),)
        mask_last = (R % tr) != 0

    in_spec = pl.BlockSpec((tr, LANE), lambda t: (t, 0))

    kernel = functools.partial(
        _traj_loss_kernel, valid_rows=R, tile_rows=tr, mask_last=mask_last)

    out = pl.pallas_call(
        kernel,
        out_shape=jax.ShapeDtypeStruct((1, 1), jnp.float32),
        grid=grid,
        in_specs=[in_spec, in_spec, in_spec, in_spec],
        out_specs=pl.BlockSpec(memory_space=pltpu.SMEM),
        scratch_shapes=[pltpu.VMEM((tr, LANE), jnp.float32)],
        compiler_params=pltpu.CompilerParams(
            dimension_semantics=("arbitrary",)),
    )(np2d, fp2d, nt2d, ft2d)

    loss = out[0, 0]
    if sub:
        return loss / r
    return loss


def _reference(np_, fp_, nt_, ft_, sub=False, r=10.0):
    np_ = jnp.asarray(np_, jnp.float32).reshape(-1)
    fp_ = jnp.asarray(fp_, jnp.float32).reshape(-1)
    nt_ = jnp.asarray(nt_, jnp.float32).reshape(-1)
    ft_ = jnp.asarray(ft_, jnp.float32).reshape(-1)
    dn = nt_ - np_
    df = ft_ - fp_
    loss = jnp.sum(nt_ * dn * dn) + jnp.sum(ft_ * df * df)
    return loss / r if sub else loss


if __name__ == "__main__":
    # Small shapes consistent with the module: batch_size=2, r=10
    # -> per-batch group of 1 anchor + 10 negatives = 22 distances per vector.
    batch_size = 2
    r = 10.0
    N = batch_size * (1 + int(r))  # 22

    key = jax.random.PRNGKey(0)
    k1, k2, k3, k4 = jax.random.split(key, 4)
    nearest_predict = jax.random.uniform(k1, (N,), jnp.float32)
    farest_predict = jax.random.uniform(k2, (N,), jnp.float32)
    nearest_target = jax.random.uniform(k3, (N,), jnp.float32)
    farest_target = jax.random.uniform(k4, (N,), jnp.float32)

    out = trajectory_distance_loss(nearest_predict, farest_predict,
                                   nearest_target, farest_target,
                                   sub=False, r=r)
    out = jax.block_until_ready(out)
    ref = _reference(nearest_predict, farest_predict,
                     nearest_target, farest_target, sub=False, r=r)
    assert jnp.allclose(out, ref, rtol=1e-5, atol=1e-5), (out, ref)

    # sub=True path (loss / r)
    out_sub = jax.block_until_ready(
        trajectory_distance_loss(nearest_predict, farest_predict,
                                 nearest_target, farest_target,
                                 sub=True, r=r))
    ref_sub = _reference(nearest_predict, farest_predict,
                         nearest_target, farest_target, sub=True, r=r)
    assert jnp.allclose(out_sub, ref_sub, rtol=1e-5, atol=1e-5), (out_sub, ref_sub)

    # Exercise the multi-tile (grid > 1) + ragged-last-tile masking path with a
    # larger, non-aligned size to validate the accumulator/masking logic.
    N_big = MAX_TR * LANE + 3 * LANE + 17  # > one tile, not lane- or row-aligned
    b1, b2, b3, b4 = jax.random.split(jax.random.PRNGKey(1), 4)
    big_np = jax.random.uniform(b1, (N_big,), jnp.float32)
    big_fp = jax.random.uniform(b2, (N_big,), jnp.float32)
    big_nt = jax.random.uniform(b3, (N_big,), jnp.float32)
    big_ft = jax.random.uniform(b4, (N_big,), jnp.float32)
    out_big = jax.block_until_ready(
        trajectory_distance_loss(big_np, big_fp, big_nt, big_ft, sub=False, r=r))
    ref_big = _reference(big_np, big_fp, big_nt, big_ft, sub=False, r=r)
    assert jnp.allclose(out_big, ref_big, rtol=1e-4, atol=1e-4), (out_big, ref_big)

    print("KERNEL_OK")
</pallas_src>

<mosaic_0001>
module attributes {stable_mosaic.version = 11 : i64} {
  func.func @_traj_loss_kernel(%arg0: i32, %arg1: memref<1x128xf32, #tpu.memory_space<vmem>>, %arg2: memref<1x128xf32, #tpu.memory_space<vmem>>, %arg3: memref<1x128xf32, #tpu.memory_space<vmem>>, %arg4: memref<1x128xf32, #tpu.memory_space<vmem>>, %arg5: memref<1x1xf32, #tpu.memory_space<smem>>, %arg6: memref<1x128xf32, #tpu.memory_space<vmem>>) attributes {dimension_semantics = [#tpu.dimension_semantics<arbitrary>], iteration_bounds = array<i64: 1>, scalar_prefetch = 0 : i64, scratch_operands = 1 : i64, tpu.core_type = #tpu.core_type<tc>, window_params = [{transform_indices = @transform_0, window_bounds = array<i64: 1, 128>}, {transform_indices = @transform_1, window_bounds = array<i64: 1, 128>}, {transform_indices = @transform_2, window_bounds = array<i64: 1, 128>}, {transform_indices = @transform_3, window_bounds = array<i64: 1, 128>}, {transform_indices = @transform_4, window_bounds = array<i64: 1, 1>}]} {
    %c0_i32 = arith.constant 0 : i32
    %0 = arith.cmpi eq, %arg0, %c0_i32 : i32
    %1 = arith.extui %0 : i1 to i32
    %c0_i32_0 = arith.constant 0 : i32
    %2 = arith.cmpi ne, %1, %c0_i32_0 : i32
    scf.if %2 {
      %cst = arith.constant 0.000000e+00 : f32
      %20 = vector.broadcast %cst : f32 to vector<1x128xf32>
      %c0_14 = arith.constant 0 : index
      %c0_15 = arith.constant 0 : index
      %21 = vector.load %arg6[%c0_14, %c0_15] : memref<1x128xf32, #tpu.memory_space<vmem>>, vector<1x128xf32>
      tpu.vector_store %arg6[%c0_14, %c0_15], %20 {strides = array<i32>} : memref<1x128xf32, #tpu.memory_space<vmem>>, vector<1x128xf32>,
    } else {
    }
    %c0 = arith.constant 0 : index
    %c0_1 = arith.constant 0 : index
    %3 = vector.load %arg3[%c0, %c0_1] : memref<1x128xf32, #tpu.memory_space<vmem>>, vector<1x128xf32>
    %c0_2 = arith.constant 0 : index
    %c0_3 = arith.constant 0 : index
    %4 = vector.load %arg4[%c0_2, %c0_3] : memref<1x128xf32, #tpu.memory_space<vmem>>, vector<1x128xf32>
    %c0_4 = arith.constant 0 : index
    %c0_5 = arith.constant 0 : index
    %5 = vector.load %arg1[%c0_4, %c0_5] : memref<1x128xf32, #tpu.memory_space<vmem>>, vector<1x128xf32>
    %6 = arith.subf %3, %5 : vector<1x128xf32>
    %c0_6 = arith.constant 0 : index
    %c0_7 = arith.constant 0 : index
    %7 = vector.load %arg2[%c0_6, %c0_7] : memref<1x128xf32, #tpu.memory_space<vmem>>, vector<1x128xf32>
    %8 = arith.subf %4, %7 : vector<1x128xf32>
    %9 = arith.mulf %3, %6 : vector<1x128xf32>
    %10 = arith.mulf %9, %6 : vector<1x128xf32>
    %11 = arith.mulf %4, %8 : vector<1x128xf32>
    %12 = arith.mulf %11, %8 : vector<1x128xf32>
    %13 = arith.addf %10, %12 : vector<1x128xf32>
    %c0_8 = arith.constant 0 : index
    %c0_9 = arith.constant 0 : index
    %14 = vector.load %arg6[%c0_8, %c0_9] : memref<1x128xf32, #tpu.memory_space<vmem>>, vector<1x128xf32>
    %15 = arith.addf %14, %13 : vector<1x128xf32>
    %c0_10 = arith.constant 0 : index
    %c0_11 = arith.constant 0 : index
    %16 = vector.load %arg6[%c0_10, %c0_11] : memref<1x128xf32, #tpu.memory_space<vmem>>, vector<1x128xf32>
    tpu.vector_store %arg6[%c0_10, %c0_11], %15 {strides = array<i32>} : memref<1x128xf32, #tpu.memory_space<vmem>>, vector<1x128xf32>,
    %c0_i32_12 = arith.constant 0 : i32
    %17 = arith.cmpi eq, %arg0, %c0_i32_12 : i32
    %18 = arith.extui %17 : i1 to i32
    %c0_i32_13 = arith.constant 0 : i32
    %19 = arith.cmpi ne, %18, %c0_i32_13 : i32
    scf.if %19 {
      %c0_14 = arith.constant 0 : index
      %c0_15 = arith.constant 0 : index
      %20 = vector.load %arg6[%c0_14, %c0_15] : memref<1x128xf32, #tpu.memory_space<vmem>>, vector<1x128xf32>
      %21 = vector.shape_cast %20 : vector<1x128xf32> to vector<1x1x128xf32>
      %cst = arith.constant dense<0.000000e+00> : vector<1xf32>
      %22 = vector.multi_reduction <add>, %21, %cst [1, 2] : vector<1x1x128xf32> to vector<1xf32>
      %23 = vector.shape_cast %22 : vector<1xf32> to vector<1x1x1xf32>
      %24 = vector.extract %23[0, 0, 0] : f32 from vector<1x1x1xf32>
      %c0_16 = arith.constant 0 : index
      %c0_17 = arith.constant 0 : index
      %25 = memref.load %arg5[%c0_16, %c0_17] : memref<1x1xf32, #tpu.memory_space<smem>>
      memref.store %24, %arg5[%c0_16, %c0_17] : memref<1x1xf32, #tpu.memory_space<smem>>
    } else {
    }
    return
  }
  func.func @transform_0(%arg0: i32) -> (i32, i32) {
    %c0_i32 = arith.constant 0 : i32
    %c0_i32_0 = arith.constant 0 : i32
    return %arg0, %c0_i32 : i32, i32
  }
  func.func @transform_1(%arg0: i32) -> (i32, i32) {
    %c0_i32 = arith.constant 0 : i32
    %c0_i32_0 = arith.constant 0 : i32
    return %arg0, %c0_i32 : i32, i32
  }
  func.func @transform_2(%arg0: i32) -> (i32, i32) {
    %c0_i32 = arith.constant 0 : i32
    %c0_i32_0 = arith.constant 0 : i32
    return %arg0, %c0_i32 : i32, i32
  }
  func.func @transform_3(%arg0: i32) -> (i32, i32) {
    %c0_i32 = arith.constant 0 : i32
    %c0_i32_0 = arith.constant 0 : i32
    return %arg0, %c0_i32 : i32, i32
  }
  func.func @transform_4(%arg0: i32) -> (i32, i32) {
    %c0_i32 = arith.constant 0 : i32
    %c0_i32_0 = arith.constant 0 : i32
    %c0_i32_1 = arith.constant 0 : i32
    return %c0_i32, %c0_i32_0 : i32, i32
  }
}

</mosaic_0001>

<bundles_post_ra>
// kernel: tpu_custom_call.1
= control target key start
LH: loop header
LB: loop body
LE: loop exit
PB: predicated region body
PF: predicated region fallthrough
CT: control target
= control target key end

     0   :  { %9 = vsyncpa [#allocation4], 0  ;;  %s182_s0 = inlined_call_operand.hbm [shape: f32[1,128], index: 0, kind: input, shape index: {}]   ;;  %s183_s1 = inlined_call_operand.vmem [shape: f32[1,128], index: 1, kind: input, shape index: {}]   ;;  %s184_s2 = inlined_call_operand.vmem [shape: f32[1,128], index: 2, kind: input, shape index: {}]   ;;  %s185_s3 = inlined_call_operand.vmem [shape: f32[1,128], index: 3, kind: input, shape index: {}]   ;;  %s186_s4 = inlined_call_operand.hbm [shape: f32[1,1], index: 4, kind: output, shape index: {}]  }
   0x1   :  { %10 = vsyncpa [#allocation5], 0  ;;  %s121_s15 = smov [#allocation3]   ;;  %s85_s19 = scalar_lea.hbm %s182_s0, 16 }
   0x2   :  { %s17_s16 = sshll.u32 %s121_s15, 4  ;;  %p86_p0 = scmp.ne.s32.totalorder %s182_s0, %s85_s19  ;;  %s18_s16 = int_to_ptr.vmem [resolvable:$true] %s17_s16 }
   0x3   :  { %p89_p1 = scmp.lt.u32.totalorder %s85_s19, %s182_s0 }
   0x5   :  { %p91_p2 = pnand %p89_p1, %p86_p0 }
   0x7   :  { %94 = shalt.err (!%p91_p2)
}
   0x8   :  { %s95_s24 = scalar_lea.vmem %s18_s16, 16  ;;  %s99_s25 = scalar_lea.vmem %s18_s16, 32 }
   0x9   :  { %p96_p3 = scmp.ne.s32.totalorder %s18_s16, %s95_s24  ;;  %p100_p4 = scmp.lt.s32.totalorder %s18_s16, %s18_s16 }
   0xa   :  { %p101_p5 = scmp.lt.s32.totalorder %s99_s25, %s95_s24 }
   0xc   :  { %p102_p6 = por %p101_p5, %p100_p4 }
   0xe   :  { %p103_p7 = pnand %p102_p6, %p96_p3 }
  0x10   :  { %106 = shalt.err (!%p103_p7)
}
  0x11   :  { %20 = dma.hbm_to_vmem [thread:$0]  %s182_s0, 16, %s18_s16, [#allocation4]  }
  0x12   :  { %117 = dma.done.wait [#allocation4], 16  }
  0x13   :  { %118 = vsyncadd [#allocation4], 4294967280  ;;  %v122_v0 = vmov 0.0   ;;  %v35_v1 = vld [vmem:[%s184_s2] sm:$0x1]  ;;  %vm53_vm0 = vcmask 1040384  }
  0x14   :  { %34 = vst [vmem:[#allocation2] sm:$0x1] %v122_v0  ;;  %v36_v2 = vld [vmem:[%s185_s3] sm:$0x1]  ;;  %v37_v3 = vld [vmem:[#allocation3] sm:$0x1] }
  0x15   :  { %v38_v4 = vsub.f32 %v35_v1, %v37_v3  ;;  %v39_v5 = vld [vmem:[%s183_s1] sm:$0x1]  ;;  %s107_s3 = scalar_lea.hbm %s186_s4, 16 }
  0x16   :  { %v40_v6 = vsub.f32 %v36_v2, %v39_v5  ;;  %p108_p8 = scmp.ne.s32.totalorder %s186_s4, %s107_s3  ;;  %p111_p9 = scmp.lt.u32.totalorder %s107_s3, %s186_s4 }
  0x17   :  { %v41_v7 = vmul.f32 %v38_v4, %v35_v1 }
  0x18   :  { %v43_v8 = vmul.f32 %v40_v6, %v36_v2  ;;  %p113_p10 = pnand %p111_p9, %p108_p8 }
  0x19   :  { %v42_v9 = vmul.f32 %v41_v7, %v38_v4 }
  0x1a   :  { %v44_v10 = vmul.f32 %v43_v8, %v40_v6 }
  0x1b   :  { %v46_v11 = vld [vmem:[#allocation2] sm:$0x1] }
  0x1c   :  { %v45_v12 = vadd.f32 %v44_v10, %v42_v9 }
  0x1e   :  { %v47_v13 = vadd.f32 %v46_v11, %v45_v12 }
  0x20   :  { %48 = vst [vmem:[#allocation2] sm:$0x1] %v47_v13 }
  0x27   :  { %v52_v14 = vld [vmem:[#allocation2] sm:$0x1] }
  0x28   :  { %v54_v15 = vsel %vm53_vm0, %v52_v14, 0.0 }
  0x29   :  { %55 = vadd.xlane.f32.xlu0 %v54_v15 }
  0xb6   :  { %v56_v16 = vpop.xlane.xlu0 %55 }
  0xb7   :  { %v57_v17 = vrot.slane %v56_v16, 4 }
  0xb9   :  { %v58_v18 = vadd.f32 %v57_v17, %v56_v16 }
  0xbb   :  { %v59_v19 = vrot.slane %v58_v18, 2 }
  0xbd   :  { %v60_v20 = vadd.f32 %v59_v19, %v58_v18 }
  0xbf   :  { %v61_v21 = vrot.slane %v60_v20, 1 }
  0xc1   :  { %v62_v22 = vadd.f32 %v61_v21, %v60_v20 }
  0xc3   :  { %80 = vpush %v62_v22 }
  0xf4   :  { %s81_s0 = spop %80 }
  0xf5   :  { %65 = sst [smem:[#allocation6]] %s81_s0 }
  0xf6   :  { %116 = shalt.err (!%p113_p10)
}
  0xf7   :  { %s123_s12 = smov [#allocation6]  }
  0xf8   :  { %73 = dma.smem_to_hbm %s123_s12, 16, %s186_s4, [#allocation5]  }
  0xf9   :  { %119 = dma.done.wait [#allocation5], 16  }
  0xfa   :  { %120 = vsyncadd [#allocation5], 4294967280 }
  0xfb   :  { %77 = sfence }
  0xfc   :  { %78 = vsyncpa [#allocation4], 1 }
  0xfd   :  { %79 = vsyncpa [#allocation5], 1 }

</bundles_post_ra>
